<compile_context>
chip_gen: v5e
topology: v5e:2x2
jax: 0.10.0
libtpu: 0.0.40
codegen_flags: <defaults>
</compile_context>

<pallas_src>
import functools

import jax
import jax.numpy as jnp
from jax import lax
from jax.experimental import pallas as pl
from jax.experimental.pallas import tpu as pltpu

F_PAD = 128  # fused output width: (H + O) zero-padded to a full 128-lane slab


def _rnn_seq_kernel(x_ref, h0_ref, w_ref, b_ref, out_ref, comb_ref, *,
                    input_size, hidden_size, steps_per_block):
    """One grid step == `steps_per_block` RNN time steps.

    comb_ref is a persistent (B, I+H) VMEM scratch: [:, :I] holds x_t and
    [:, I:] carries the hidden state across time steps AND grid iterations.
    """
    tc = pl.program_id(0)

    @pl.when(tc == 0)
    def _():
        comb_ref[:, input_size:] = h0_ref[...].astype(comb_ref.dtype)

    def step(i, carry):
        comb_ref[:, :input_size] = x_ref[i].astype(comb_ref.dtype)
        # Single fused MXU contraction:
        #   cat(x_t, h) @ cat(W_i2h, W_i2o).T   (columns zero-padded to 128)
        acc = jnp.dot(comb_ref[...], w_ref[...],
                      preferred_element_type=jnp.float32)
        acc = acc + b_ref[...]                      # fused (1, 128) bias
        fused = jnp.maximum(acc, 0.0)               # ReLU on (B, 128)
        out_ref[i] = fused.astype(out_ref.dtype)    # lane-dense (B, 128) store
        comb_ref[:, input_size:] = fused[:, :hidden_size]   # carry hidden
        return carry

    lax.fori_loop(0, steps_per_block, step, 0, unroll=True)


def rnn_sequence(xs, h0, w_fused, b_fused, *, input_size, hidden_size,
                 output_size, time_block=8):
    """Run the RNN cell over a whole sequence inside one pallas_call.

    xs:      (T, B, I)        float32
    h0:      (B, H)           float32
    w_fused: (I+H, 128)       fused, pre-transposed, zero-padded weight
    b_fused: (1, 128)         fused, zero-padded bias
    returns (outputs (T, B, O), hiddens (T, B, H))
    """
    T, B, I = xs.shape
    H = hidden_size
    assert I == input_size
    assert w_fused.shape == (I + H, F_PAD)
    assert b_fused.shape == (1, F_PAD)
    assert h0.shape == (B, H)

    Tc = min(time_block, T)
    n_blocks = pl.cdiv(T, Tc)
    T_pad = n_blocks * Tc
    if T_pad != T:
        # Padded time steps run after the real ones, so outputs for t < T are
        # unaffected; they are sliced away below.
        xs = jnp.concatenate(
            [xs, jnp.zeros((T_pad - T, B, I), xs.dtype)], axis=0)

    # VMEM budget (double-buffered streamed blocks + resident operands) --
    # keep well under the scoped limit (16 MiB v5e / 32 MiB v6e & v7x).
    vmem_bytes = 4 * (2 * Tc * B * I            # streamed x blocks
                      + 2 * Tc * B * F_PAD      # streamed out blocks
                      + (I + H) * F_PAD + F_PAD + B * H   # resident W, b, h0
                      + B * (I + H))            # combined scratch
    assert vmem_bytes < 8 * 1024 * 1024, "shrink time_block: VMEM budget"

    kernel = functools.partial(_rnn_seq_kernel, input_size=I, hidden_size=H,
                               steps_per_block=Tc)

    cost = pl.CostEstimate(
        flops=2 * T_pad * B * (I + H) * F_PAD,
        transcendentals=0,
        bytes_accessed=4 * (T_pad * B * I + B * H + (I + H) * F_PAD + F_PAD
                            + T_pad * B * F_PAD),
    )

    fused = pl.pallas_call(
        kernel,
        out_shape=jax.ShapeDtypeStruct((T_pad, B, F_PAD), jnp.float32),
        grid_spec=pltpu.PrefetchScalarGridSpec(
            num_scalar_prefetch=0,
            grid=(n_blocks,),
            in_specs=[
                pl.BlockSpec((Tc, B, I), lambda t: (t, 0, 0)),      # stream x
                pl.BlockSpec((B, H), lambda t: (0, 0)),             # h0
                pl.BlockSpec((I + H, F_PAD), lambda t: (0, 0)),     # W (resident)
                pl.BlockSpec((1, F_PAD), lambda t: (0, 0)),         # bias
            ],
            out_specs=pl.BlockSpec((Tc, B, F_PAD), lambda t: (t, 0, 0)),
            scratch_shapes=[pltpu.VMEM((B, I + H), jnp.float32)],   # combined/hidden carry
        ),
        compiler_params=pltpu.CompilerParams(
            dimension_semantics=("arbitrary",)),   # time recurrence is serial
        cost_estimate=cost,
    )(xs, h0, w_fused, b_fused)

    hiddens = fused[:T, :, :H]
    outputs = fused[:T, :, H:H + output_size]
    return outputs, hiddens


def rnn_forward(x, hidden, w_fused, b_fused, *, input_size, hidden_size,
                output_size):
    """Single-step forward matching RNN.forward(input, hidden) -> (output, hidden)."""
    outputs, hiddens = rnn_sequence(
        x[None], hidden, w_fused, b_fused, input_size=input_size,
        hidden_size=hidden_size, output_size=output_size, time_block=1)
    return outputs[0], hiddens[0]


def prepare_params(w_i2h, b_i2h, w_i2o, b_i2o):
    """One-time weight prep: fuse the two Linear layers, transpose to
    [in, out] layout, and zero-pad the fused feature dim (H+O) up to 128 so
    the kernel's per-step store is lane-dense."""
    H = w_i2h.shape[0]
    O = w_i2o.shape[0]
    assert H + O <= F_PAD
    w_t = jnp.concatenate([w_i2h, w_i2o], axis=0).T            # (I+H, H+O)
    b = jnp.concatenate([b_i2h, b_i2o])                        # (H+O,)
    pad = F_PAD - (H + O)
    w_fused = jnp.pad(w_t, ((0, 0), (0, pad)))                 # (I+H, 128)
    b_fused = jnp.pad(b, (0, pad)).reshape(1, F_PAD)           # (1,   128)
    return w_fused, b_fused


def init_params(key, input_size, hidden_size, output_size):
    """Deterministic init mimicking nn.Linear default (uniform +/- 1/sqrt(fan_in))."""
    k1, k2, k3, k4 = jax.random.split(key, 4)
    fan_in = input_size + hidden_size
    bound = 1.0 / jnp.sqrt(fan_in)
    w_i2h = jax.random.uniform(k1, (hidden_size, fan_in), jnp.float32, -bound, bound)
    b_i2h = jax.random.uniform(k2, (hidden_size,), jnp.float32, -bound, bound)
    w_i2o = jax.random.uniform(k3, (output_size, fan_in), jnp.float32, -bound, bound)
    b_i2o = jax.random.uniform(k4, (output_size,), jnp.float32, -bound, bound)
    return w_i2h, b_i2h, w_i2o, b_i2o


if __name__ == "__main__":
    input_size, hidden_size, output_size = 32, 32, 16
    batch, seq_len = 8, 8

    key = jax.random.PRNGKey(0)
    kx, kp = jax.random.split(key, 2)

    xs = jax.random.normal(kx, (seq_len, batch, input_size), jnp.float32)
    hidden0 = jnp.zeros((batch, hidden_size), jnp.float32)        # initHidden()
    w_i2h, b_i2h, w_i2o, b_i2o = init_params(kp, input_size, hidden_size, output_size)
    w_fused, b_fused = prepare_params(w_i2h, b_i2h, w_i2o, b_i2o)

    # Pure-JAX reference for one PyTorch-forward step (matches the module:
    # ReLU on both heads).
    def ref_step(x, h):
        combined = jnp.concatenate([x, h], axis=1)
        h_new = jnp.maximum(combined @ w_i2h.T + b_i2h, 0.0)
        out = jnp.maximum(combined @ w_i2o.T + b_i2o, 0.0)
        return out, h_new

    # --- single step (exactly the module's forward) -------------------------
    out1, hid1 = rnn_forward(xs[0], hidden0, w_fused, b_fused,
                             input_size=input_size, hidden_size=hidden_size,
                             output_size=output_size)
    jax.block_until_ready((out1, hid1))
    ref_out1, ref_hid1 = ref_step(xs[0], hidden0)
    assert jnp.allclose(out1, ref_out1, atol=1e-5), "single-step output mismatch"
    assert jnp.allclose(hid1, ref_hid1, atol=1e-5), "single-step hidden mismatch"

    # --- full sequence, one pallas_call, time-blocked grid ------------------
    outs, hids = rnn_sequence(xs, hidden0, w_fused, b_fused,
                              input_size=input_size, hidden_size=hidden_size,
                              output_size=output_size, time_block=8)
    jax.block_until_ready((outs, hids))

    h = hidden0
    for t in range(seq_len):
        ref_out, h = ref_step(xs[t], h)
        assert jnp.allclose(outs[t], ref_out, atol=1e-5), f"seq output mismatch @t={t}"
        assert jnp.allclose(hids[t], h, atol=1e-5), f"seq hidden mismatch @t={t}"

    print("KERNEL_OK")
</pallas_src>

<mosaic_0001>
module attributes {stable_mosaic.version = 11 : i64} {
  func.func @_rnn_seq_kernel(%arg0: i32, %arg1: memref<1x8x32xf32, #tpu.memory_space<vmem>>, %arg2: memref<8x32xf32, #tpu.memory_space<vmem>>, %arg3: memref<64x128xf32, #tpu.memory_space<vmem>>, %arg4: memref<1x128xf32, #tpu.memory_space<vmem>>, %arg5: memref<1x8x128xf32, #tpu.memory_space<vmem>>, %arg6: memref<8x64xf32, #tpu.memory_space<vmem>>) attributes {dimension_semantics = [#tpu.dimension_semantics<arbitrary>], iteration_bounds = array<i64: 1>, scalar_prefetch = 0 : i64, scratch_operands = 1 : i64, tpu.core_type = #tpu.core_type<tc>, window_params = [{transform_indices = @transform_0, window_bounds = array<i64: 1, 8, 32>}, {pipeline_mode = #tpu.pipeline_mode<synchronous>, transform_indices = @transform_1, window_bounds = array<i64: 8, 32>}, {pipeline_mode = #tpu.pipeline_mode<synchronous>, transform_indices = @transform_2, window_bounds = array<i64: 64, 128>}, {pipeline_mode = #tpu.pipeline_mode<synchronous>, transform_indices = @transform_3, window_bounds = array<i64: 1, 128>}, {transform_indices = @transform_4, window_bounds = array<i64: 1, 8, 128>}]} {
    %c0_i32 = arith.constant 0 : i32
    %0 = arith.cmpi eq, %arg0, %c0_i32 : i32
    %1 = arith.extui %0 : i1 to i32
    %c0_i32_0 = arith.constant 0 : i32
    %2 = arith.cmpi ne, %1, %c0_i32_0 : i32
    scf.if %2 {
      %c0_15 = arith.constant 0 : index
      %c0_16 = arith.constant 0 : index
      %21 = vector.load %arg2[%c0_15, %c0_16] : memref<8x32xf32, #tpu.memory_space<vmem>>, vector<8x32xf32>
      %c0_17 = arith.constant 0 : index
      %c32_18 = arith.constant 32 : index
      %22 = vector.load %arg6[%c0_17, %c32_18] : memref<8x64xf32, #tpu.memory_space<vmem>>, vector<8x32xf32>
      tpu.vector_store %arg6[%c0_17, %c32_18], %21 {strides = array<i32>} : memref<8x64xf32, #tpu.memory_space<vmem>>, vector<8x32xf32>,
    } else {
    }
    %c0_i32_1 = arith.constant 0 : i32
    %3 = arith.index_cast %c0_i32_1 : i32 to index
    %c0 = arith.constant 0 : index
    %c0_2 = arith.constant 0 : index
    %4 = vector.load %arg1[%3, %c0, %c0_2] : memref<1x8x32xf32, #tpu.memory_space<vmem>>, vector<1x8x32xf32>
    %5 = vector.shape_cast %4 : vector<1x8x32xf32> to vector<8x32xf32>
    %c0_3 = arith.constant 0 : index
    %c0_4 = arith.constant 0 : index
    %6 = vector.load %arg6[%c0_3, %c0_4] : memref<8x64xf32, #tpu.memory_space<vmem>>, vector<8x32xf32>
    tpu.vector_store %arg6[%c0_3, %c0_4], %5 {strides = array<i32>} : memref<8x64xf32, #tpu.memory_space<vmem>>, vector<8x32xf32>,
    %c0_5 = arith.constant 0 : index
    %c0_6 = arith.constant 0 : index
    %7 = vector.load %arg6[%c0_5, %c0_6] : memref<8x64xf32, #tpu.memory_space<vmem>>, vector<8x64xf32>
    %c0_7 = arith.constant 0 : index
    %c0_8 = arith.constant 0 : index
    %8 = vector.load %arg3[%c0_7, %c0_8] : memref<64x128xf32, #tpu.memory_space<vmem>>, vector<64x128xf32>
    %cst = arith.constant dense<0.000000e+00> : vector<8x128xf32>
    %9 = tpu.matmul %7, %8, %cst {dimension_numbers = #tpu.dot_dimension_numbers<[1], [0], [0], [1], [0, 0, 1, 1], [], []>} : vector<8x64xf32>, vector<64x128xf32>, vector<8x128xf32> -> vector<8x128xf32>
    %c0_9 = arith.constant 0 : index
    %c0_10 = arith.constant 0 : index
    %10 = vector.load %arg4[%c0_9, %c0_10] : memref<1x128xf32, #tpu.memory_space<vmem>>, vector<1x128xf32>
    %11 = vector.broadcast %10 : vector<1x128xf32> to vector<8x128xf32>
    %12 = arith.addf %9, %11 : vector<8x128xf32>
    %cst_11 = arith.constant 0.000000e+00 : f32
    %13 = vector.broadcast %cst_11 : f32 to vector<8x128xf32>
    %14 = arith.maximumf %12, %13 : vector<8x128xf32>
    %15 = arith.index_cast %c0_i32_1 : i32 to index
    %c0_12 = arith.constant 0 : index
    %c0_13 = arith.constant 0 : index
    %16 = vector.load %arg5[%15, %c0_12, %c0_13] : memref<1x8x128xf32, #tpu.memory_space<vmem>>, vector<1x8x128xf32>
    %17 = vector.shape_cast %16 : vector<1x8x128xf32> to vector<8x128xf32>
    %18 = vector.shape_cast %14 : vector<8x128xf32> to vector<1x8x128xf32>
    tpu.vector_store %arg5[%15, %c0_12, %c0_13], %18 {strides = array<i32>} : memref<1x8x128xf32, #tpu.memory_space<vmem>>, vector<1x8x128xf32>,
    %19 = vector.extract_strided_slice %14 {offsets = [0, 0], sizes = [8, 32], strides = [1, 1]} : vector<8x128xf32> to vector<8x32xf32>
    %c0_14 = arith.constant 0 : index
    %c32 = arith.constant 32 : index
    %20 = vector.load %arg6[%c0_14, %c32] : memref<8x64xf32, #tpu.memory_space<vmem>>, vector<8x32xf32>
    tpu.vector_store %arg6[%c0_14, %c32], %19 {strides = array<i32>} : memref<8x64xf32, #tpu.memory_space<vmem>>, vector<8x32xf32>,
    %c1_i32 = arith.constant 1 : i32
    return
  }
  func.func @transform_0(%arg0: i32) -> (i32, i32, i32) {
    %c0_i32 = arith.constant 0 : i32
    %c0_i32_0 = arith.constant 0 : i32
    %c0_i32_1 = arith.constant 0 : i32
    return %arg0, %c0_i32, %c0_i32_0 : i32, i32, i32
  }
  func.func @transform_1(%arg0: i32) -> (i32, i32) {
    %c0_i32 = arith.constant 0 : i32
    %c0_i32_0 = arith.constant 0 : i32
    %c0_i32_1 = arith.constant 0 : i32
    return %c0_i32, %c0_i32_0 : i32, i32
  }
  func.func @transform_2(%arg0: i32) -> (i32, i32) {
    %c0_i32 = arith.constant 0 : i32
    %c0_i32_0 = arith.constant 0 : i32
    %c0_i32_1 = arith.constant 0 : i32
    return %c0_i32, %c0_i32_0 : i32, i32
  }
  func.func @transform_3(%arg0: i32) -> (i32, i32) {
    %c0_i32 = arith.constant 0 : i32
    %c0_i32_0 = arith.constant 0 : i32
    %c0_i32_1 = arith.constant 0 : i32
    return %c0_i32, %c0_i32_0 : i32, i32
  }
  func.func @transform_4(%arg0: i32) -> (i32, i32, i32) {
    %c0_i32 = arith.constant 0 : i32
    %c0_i32_0 = arith.constant 0 : i32
    %c0_i32_1 = arith.constant 0 : i32
    return %arg0, %c0_i32, %c0_i32_0 : i32, i32, i32
  }
}

</mosaic_0001>

<bundles_post_ra>
// kernel: tpu_custom_call.1
= control target key start
LH: loop header
LB: loop body
LE: loop exit
PB: predicated region body
PF: predicated region fallthrough
CT: control target
= control target key end

     0   :  { %9 = vsyncpa [#allocation4], 0  ;;  %s300_s0 = inlined_call_operand.hbm [shape: f32[1,8,32], index: 0, kind: input, shape index: {}]   ;;  %s301_s1 = inlined_call_operand.hbm [shape: f32[8,32], index: 1, kind: input, shape index: {}]   ;;  %s302_s2 = inlined_call_operand.hbm [shape: f32[64,128], index: 2, kind: input, shape index: {}]   ;;  %s303_s3 = inlined_call_operand.vmem [shape: f32[1,128], index: 3, kind: input, shape index: {}]   ;;  %s304_s4 = inlined_call_operand.hbm [shape: f32[1,8,128], index: 4, kind: output, shape index: {}]  }
   0x1   :  { %10 = vsyncpa [#allocation7], 0  ;;  %s28_s17 = sshll.u32 %s301_s1, 4  ;;  %s29_s17 = int_to_ptr.hbm [resolvable:$true] %s28_s17 }
   0x2   :  { %11 = vsyncpa [#allocation5], 0  ;;  %s249_s18 = smov [#allocation6]   ;;  %s17_s22 = sshll.u32 %s300_s0, 4  ;;  %s18_s22 = int_to_ptr.hbm [resolvable:$true] %s17_s22 }
   0x3   :  { %s30_s19 = sshll.u32 %s249_s18, 4  ;;  %s250_s23 = smov [#allocation3]   ;;  %s31_s19 = int_to_ptr.vmem [resolvable:$true] %s30_s19 }
   0x4   :  { %33 = dma.hbm_to_vmem [thread:$0]  %s29_s17, 128, %s31_s19, [#allocation7]  }
   0x5   :  { %s19_s24 = sshll.u32 %s250_s23, 4  ;;  %s38_s27 = sshll.u32 %s302_s2, 4  ;;  %s20_s24 = int_to_ptr.vmem [resolvable:$true] %s19_s24  ;;  %s39_s27 = int_to_ptr.hbm [resolvable:$true] %s38_s27 }
   0x6   :  { %22 = dma.hbm_to_vmem [thread:$0]  %s18_s22, 128, %s20_s24, [#allocation4]  }
   0x7   :  { %s251_s1 = smov [#allocation8]   ;;  %s252_s29 = smov 128  }
   0x8   :  { %s40_s28 = sshll.u32 %s251_s1, 4  ;;  %s253_s30 = smov 8   ;;  %s41_s28 = int_to_ptr.vmem [resolvable:$true] %s40_s28 }
   0x9   :  { %46 = dma.hbm_to_vmem [thread:$0]  %s39_s27, 1024, %s41_s28, [#allocation7], %s252_s29, %s252_s29, %s253_s30  }
   0xa   :  { %243 = dma.done.wait [#allocation4], 128  }
   0xb   :  { %244 = vsyncadd [#allocation4], 4294967168 }
   0xc   :  { %245 = dma.done.wait [#allocation7], 1152  }
   0xd   :  { %246 = vsyncadd [#allocation7], 4294966144  ;;  %v65_v0 = vld [vmem:[#allocation6] sm:$0xff]  ;;  %v82_v2 = vld [vmem:[#allocation8 + $0x30] sm:$0xff]  ;;  %s254_s0 = smov 32   ;;  %vm70_vm0 = vcmask 523520  }
   0xe   :  { %v83_v1 = vld [vmem:[#allocation8 + $0x38] sm:$0xff]  ;;  %67 = vrot.lane.b32.xlu0 %v65_v0, %s254_s0  ;;  %v81_v3 = vld [vmem:[#allocation8 + $0x28] sm:$0xff]  ;;  %v80_v4 = vld [vmem:[#allocation8 + $0x20] sm:$0xff]  ;;  %vm73_vm1 = vcmask 261120   ;;  %vm88_vm2 = vcmask 523264   ;;  %s255_s6 = smov [#allocation9]  }
   0xf   :  { %100 = vmatpush.msra.mxu0 %v83_v1  ;;  %v79_v5 = vld [vmem:[#allocation8 + $0x18] sm:$0xff]  ;;  %v78_v6 = vld [vmem:[#allocation8 + $0x10] sm:$0xff]  ;;  %v77_v7 = vld [vmem:[#allocation8 + $0x8] sm:$0xff]  ;;  %s125_s7 = sshll.u32 %s255_s6, 4  ;;  %s127_s10 = sshll.u32 %s304_s4, 4  ;;  %s126_s7 = int_to_ptr.vmem [resolvable:$true] %s125_s7  ;;  %s128_s10 = int_to_ptr.hbm [resolvable:$true] %s127_s10 }
  0x10   :  { %v76_v8 = vld [vmem:[#allocation8] sm:$0xff]  ;;  %v72_v9 = vld [vmem:[#allocation3] sm:$0xff]  ;;  %v146_v12 = vld [vmem:[%s303_s3] ss:$0 sm:$0xff] }
  0x11   :  { %101 = vmatpush.msra.mxu0 %v82_v2 }
  0x13   :  { %102 = vmatpush.msra.mxu0 %v81_v3 }
  0x15   :  { %103 = vmatpush.msra.mxu0 %v80_v4 }
  0x17   :  { %104 = vmatpush.msra.mxu0 %v79_v5 }
  0x19   :  { %105 = vmatpush.msra.mxu0 %v78_v6 }
  0x1b   :  { %106 = vmatpush.msra.mxu0 %v77_v7 }
  0x1d   :  { %107 = vmatpush.msra.mxu0 %v76_v8 }
  0x80   :  { %v68_v10 = vpop.permute.xlu0 %67 }
  0x81   :  { %71 = vst.msk [vmem:[#allocation2] sm:$0xff] %vm70_vm0, %v68_v10 }
  0x82   :  { %74 = vst.msk [vmem:[#allocation2] sm:$0xff] %vm73_vm1, %v72_v9 }
  0x89   :  { %v75_v11 = vld [vmem:[#allocation2] sm:$0xff] }
  0x8a   :  { %138 = vmatmul.msk.f32.vlgmr.msra.gmra.mxu0 %vm88_vm2, %v75_v11 }
 0x107   :  { %v109_v13 = vpop.f32.mrf.mxu0 }
 0x108   :  { %v110_v14 = vadd.f32 %v146_v12, %v109_v13 }
 0x10a   :  { %v112_v15 = vmax.f32 %v110_v14, 0.0 }
 0x10c   :  { %113 = vst [vmem:[#allocation9] sm:$0xff] %v112_v15  ;;  %115 = vrot.lane.b32.xlu0 %v112_v15, %s254_s0 }
 0x10d   :  { %130 = dma.vmem_to_hbm [thread:$0]  %s126_s7, 128, %s128_s10, [#allocation5]  }
 0x17e   :  { %v116_v16 = vpop.permute.xlu0 %115 }
 0x17f   :  { %119 = vst.msk [vmem:[#allocation2] sm:$0xff] %vm70_vm0, %v116_v16 }
 0x180   :  { %247 = dma.done.wait [#allocation5], 128  }
 0x181   :  { %248 = vsyncadd [#allocation5], 4294967168 }
 0x182   :  { %135 = vsyncpa [#allocation4], 1 }
 0x183   :  { %136 = vsyncpa [#allocation7], 1 }
 0x184   :  { %137 = vsyncpa [#allocation5], 1 }

</bundles_post_ra>
